<compile_context>
chip_gen: v6e
topology: v6e:2x2x1
jax: 0.10.0
libtpu: 0.0.40
codegen_flags: <defaults>
</compile_context>

<pallas_src>
import functools

import jax
import jax.numpy as jnp
from jax.experimental import pallas as pl
from jax.experimental.pallas import tpu as pltpu


def _round_up(x, m):
    return (x + m - 1) // m * m


# --------------------------- pooling (streaming) kernel ---------------------------

def _pool_kernel(x_ref, o_ref, acc_ref, *, inv_hw):
    """Grid = (row_blocks, spatial_blocks); spatial reduction axis innermost."""
    s = pl.program_id(1)

    @pl.when(s == 0)
    def _():
        acc_ref[...] = jnp.zeros_like(acc_ref)

    x = x_ref[...].astype(jnp.float32)                    # (row_blk, hw_tile)
    r, t = x.shape
    if t % 128 == 0:
        # Lane-shaped partial sums: VALU-only vreg adds in the hot loop.
        acc_ref[...] += jnp.sum(x.reshape(r, t // 128, 128), axis=1)
    else:
        # Only reachable when the full spatial extent is a single block.
        acc_ref[:, :1] += jnp.sum(x, axis=1, keepdims=True)

    @pl.when(s == pl.num_programs(1) - 1)
    def _():
        # Single cross-lane (XLU) reduce, once per row block.
        total = jnp.sum(acc_ref[...], axis=1, keepdims=True)   # (row_blk, 1)
        o_ref[...] = (total * inv_hw).astype(o_ref.dtype)


def _choose_tiles(rows, hw, itemsize, budget_bytes):
    """Tile sizes for the 2D (rows=N*C, hw=H*W) pooling stream."""
    hw_row_vmem = _round_up(hw, 128) * itemsize     # lane-padded bytes of one row in VMEM
    rows8 = _round_up(max(rows, 1), 8)
    row_blk = 8

    if row_blk * hw_row_vmem <= budget_bytes:
        # Whole spatial extent per grid step (single reduction step); grow the
        # row block while the buffer stays in budget and the parallel row axis
        # keeps >= 4 blocks (megacore / v7x two-TC sharding).
        hw_tile, hw_pad = hw, hw
        nxt = row_blk * 2
        while (nxt <= rows8 and rows8 % nxt == 0 and rows8 // nxt >= 4
               and nxt * hw_row_vmem <= budget_bytes):
            row_blk = nxt
            nxt *= 2
    else:
        # Spatial axis must be streamed: largest 128-multiple tile in budget;
        # hw is zero-padded up to a tile multiple (mean stays exact because
        # inv_hw uses the true hw).
        hw_tile = max(128, (budget_bytes // (row_blk * itemsize)) // 128 * 128)
        hw_pad = _round_up(hw, hw_tile)

    rows_pad = _round_up(rows, row_blk)
    return row_blk, hw_tile, rows_pad, hw_pad


# ----------------------- tiny FC gate (1x1 convs) kernel -----------------------

def _gate_kernel(p_ref, w1_ref, b1_ref, w2_ref, b2_ref, o_ref):
    p = p_ref[...].astype(jnp.float32)                               # (Np, Cp)
    h = jnp.dot(p, w1_ref[...].astype(jnp.float32),
                preferred_element_type=jnp.float32) + b1_ref[...].astype(jnp.float32)
    h = jnp.maximum(h, 0.0)                                          # (Np, Cmp)
    g = jnp.dot(h, w2_ref[...].astype(jnp.float32),
                preferred_element_type=jnp.float32) + b2_ref[...].astype(jnp.float32)
    o_ref[...] = jax.nn.sigmoid(g).astype(o_ref.dtype)               # (Np, Cp)


# ----------------------------------- wrapper -----------------------------------

def se_forward(x, w1, b1, w2, b2):
    """x: (N, C, H, W). w1: (C_mid, C), b1: (C_mid,), w2: (C, C_mid), b2: (C,).

    Returns (N, C, 1, 1), matching the PyTorch SE module output exactly.
    """
    N, C, H, W = x.shape
    C_mid = w1.shape[0]
    HW = H * W
    rows = N * C

    # ---- stage 1: global average pool as a streaming row reduction ----
    x2 = x.reshape(rows, HW)                          # contiguous, free

    budget = 8 << 20                                  # per-buffer VMEM budget
    row_blk, hw_tile, rows_pad, hw_pad = _choose_tiles(rows, HW, x.dtype.itemsize, budget)

    if rows_pad != rows or hw_pad != HW:
        # Zero padding: padded columns add 0 to the sum; padded rows are sliced off.
        x2 = jnp.pad(x2, ((0, rows_pad - rows), (0, hw_pad - HW)))

    grid = (rows_pad // row_blk, hw_pad // hw_tile)

    pooled = pl.pallas_call(
        functools.partial(_pool_kernel, inv_hw=1.0 / float(HW)),
        out_shape=jax.ShapeDtypeStruct((rows_pad, 1), jnp.float32),
        grid=grid,
        in_specs=[pl.BlockSpec((row_blk, hw_tile), lambda r, s: (r, s))],
        out_specs=pl.BlockSpec((row_blk, 1), lambda r, s: (r, 0)),
        scratch_shapes=[pltpu.VMEM((row_blk, 128), jnp.float32)],
        compiler_params=pltpu.CompilerParams(
            dimension_semantics=("parallel", "arbitrary"),
            vmem_limit_bytes=48 << 20,
        ),
    )(x2)

    pooled_nc = pooled[:rows, 0].reshape(N, C)        # (N, C), f32

    # ---- stage 2: 1x1 conv -> relu -> 1x1 conv -> sigmoid (tiny, single step) ----
    Np = _round_up(N, 8)
    Cp = _round_up(C, 128)
    Cmp = _round_up(C_mid, 128)

    p_pad = jnp.pad(pooled_nc, ((0, Np - N), (0, Cp - C)))
    w1t = jnp.pad(jnp.transpose(w1).astype(jnp.float32),
                  ((0, Cp - C), (0, Cmp - C_mid)))                    # (Cp, Cmp)
    b1r = jnp.pad(b1.astype(jnp.float32).reshape(1, C_mid),
                  ((0, 0), (0, Cmp - C_mid)))                         # (1, Cmp)
    w2t = jnp.pad(jnp.transpose(w2).astype(jnp.float32),
                  ((0, Cmp - C_mid), (0, Cp - C)))                    # (Cmp, Cp)
    b2r = jnp.pad(b2.astype(jnp.float32).reshape(1, C),
                  ((0, 0), (0, Cp - C)))                              # (1, Cp)

    gate = pl.pallas_call(
        _gate_kernel,
        out_shape=jax.ShapeDtypeStruct((Np, Cp), x.dtype),
    )(p_pad, w1t, b1r, w2t, b2r)

    return gate[:N, :C].reshape(N, C, 1, 1)


def se_reference(x, w1, b1, w2, b2):
    pooled = jnp.mean(x, axis=(2, 3))                      # (N, C)
    h = jnp.maximum(pooled @ w1.T + b1[None, :], 0.0)      # (N, C_mid)
    g = jax.nn.sigmoid(h @ w2.T + b2[None, :])             # (N, C)
    return g.reshape(x.shape[0], x.shape[1], 1, 1).astype(x.dtype)


if __name__ == "__main__":
    # Module config: in_chnls=4, ratio=2  ->  compress: 4->2, excitation: 2->4
    N, C, H, W = 2, 4, 16, 16
    ratio = 2
    C_mid = C // ratio

    key = jax.random.PRNGKey(0)
    kx, k1, k2, k3, k4 = jax.random.split(key, 5)

    x = jax.random.normal(kx, (N, C, H, W), dtype=jnp.float32)
    # 1x1-conv weights squeezed to matrices (PyTorch conv weight[:, :, 0, 0]).
    w1 = jax.random.normal(k1, (C_mid, C), dtype=jnp.float32) * 0.5   # compress
    b1 = jax.random.normal(k2, (C_mid,), dtype=jnp.float32) * 0.1
    w2 = jax.random.normal(k3, (C, C_mid), dtype=jnp.float32) * 0.5   # excitation
    b2 = jax.random.normal(k4, (C,), dtype=jnp.float32) * 0.1

    out = jax.jit(se_forward)(x, w1, b1, w2, b2)
    out = jax.block_until_ready(out)

    ref = se_reference(x, w1, b1, w2, b2)
    assert out.shape == (N, C, 1, 1)
    assert jnp.allclose(out, ref, atol=1e-5, rtol=1e-5), float(jnp.max(jnp.abs(out - ref)))

    print("KERNEL_OK")
</pallas_src>

<mosaic_0001>
module attributes {stable_mosaic.version = 11 : i64} {
  func.func @_gate_kernel(%arg0: memref<8x128xf32, #tpu.memory_space<vmem>>, %arg1: memref<128x128xf32, #tpu.memory_space<vmem>>, %arg2: memref<1x128xf32, #tpu.memory_space<vmem>>, %arg3: memref<128x128xf32, #tpu.memory_space<vmem>>, %arg4: memref<1x128xf32, #tpu.memory_space<vmem>>, %arg5: memref<8x128xf32, #tpu.memory_space<vmem>>) attributes {dimension_semantics = [], scalar_prefetch = 0 : i64, scratch_operands = 0 : i64, tpu.core_type = #tpu.core_type<tc>} {
    %c0 = arith.constant 0 : index
    %c0_0 = arith.constant 0 : index
    %0 = vector.load %arg0[%c0, %c0_0] : memref<8x128xf32, #tpu.memory_space<vmem>>, vector<8x128xf32>
    %c0_1 = arith.constant 0 : index
    %c0_2 = arith.constant 0 : index
    %1 = vector.load %arg1[%c0_1, %c0_2] : memref<128x128xf32, #tpu.memory_space<vmem>>, vector<128x128xf32>
    %cst = arith.constant dense<0.000000e+00> : vector<8x128xf32>
    %2 = tpu.matmul %0, %1, %cst {dimension_numbers = #tpu.dot_dimension_numbers<[1], [0], [0], [1], [0, 0, 1, 1], [], []>} : vector<8x128xf32>, vector<128x128xf32>, vector<8x128xf32> -> vector<8x128xf32>
    %c0_3 = arith.constant 0 : index
    %c0_4 = arith.constant 0 : index
    %3 = vector.load %arg2[%c0_3, %c0_4] : memref<1x128xf32, #tpu.memory_space<vmem>>, vector<1x128xf32>
    %4 = vector.broadcast %3 : vector<1x128xf32> to vector<8x128xf32>
    %5 = arith.addf %2, %4 : vector<8x128xf32>
    %cst_5 = arith.constant 0.000000e+00 : f32
    %6 = vector.broadcast %cst_5 : f32 to vector<8x128xf32>
    %7 = arith.maximumf %5, %6 : vector<8x128xf32>
    %c0_6 = arith.constant 0 : index
    %c0_7 = arith.constant 0 : index
    %8 = vector.load %arg3[%c0_6, %c0_7] : memref<128x128xf32, #tpu.memory_space<vmem>>, vector<128x128xf32>
    %cst_8 = arith.constant dense<0.000000e+00> : vector<8x128xf32>
    %9 = tpu.matmul %7, %8, %cst_8 {dimension_numbers = #tpu.dot_dimension_numbers<[1], [0], [0], [1], [0, 0, 1, 1], [], []>} : vector<8x128xf32>, vector<128x128xf32>, vector<8x128xf32> -> vector<8x128xf32>
    %c0_9 = arith.constant 0 : index
    %c0_10 = arith.constant 0 : index
    %10 = vector.load %arg4[%c0_9, %c0_10] : memref<1x128xf32, #tpu.memory_space<vmem>>, vector<1x128xf32>
    %11 = vector.broadcast %10 : vector<1x128xf32> to vector<8x128xf32>
    %12 = arith.addf %9, %11 : vector<8x128xf32>
    %13 = arith.negf %12 : vector<8x128xf32>
    %14 = math.exp %13 : vector<8x128xf32>
    %cst_11 = arith.constant 1.000000e+00 : f32
    %15 = vector.broadcast %cst_11 : f32 to vector<8x128xf32>
    %16 = arith.addf %15, %14 : vector<8x128xf32>
    %17 = arith.divf %15, %16 : vector<8x128xf32>
    %c0_12 = arith.constant 0 : index
    %c0_13 = arith.constant 0 : index
    %18 = vector.load %arg5[%c0_12, %c0_13] : memref<8x128xf32, #tpu.memory_space<vmem>>, vector<8x128xf32>
    tpu.vector_store %arg5[%c0_12, %c0_13], %17 {strides = array<i32>} : memref<8x128xf32, #tpu.memory_space<vmem>>, vector<8x128xf32>,
    return
  }
}

module attributes {stable_mosaic.version = 11 : i64} {
  func.func @_pool_kernel(%arg0: i32, %arg1: i32, %arg2: memref<8x256xf32, #tpu.memory_space<vmem>>, %arg3: memref<8x1xf32, #tpu.memory_space<vmem>>, %arg4: memref<8x128xf32, #tpu.memory_space<vmem>>) attributes {dimension_semantics = [#tpu.dimension_semantics<parallel>, #tpu.dimension_semantics<arbitrary>], iteration_bounds = array<i64: 1, 1>, scalar_prefetch = 0 : i64, scratch_operands = 1 : i64, tpu.core_type = #tpu.core_type<tc>, window_params = [{transform_indices = @transform_0, window_bounds = array<i64: 8, 256>}, {transform_indices = @transform_1, window_bounds = array<i64: 8, 1>}]} {
    %c0_i32 = arith.constant 0 : i32
    %0 = arith.cmpi eq, %arg1, %c0_i32 : i32
    %1 = arith.extui %0 : i1 to i32
    %c0_i32_0 = arith.constant 0 : i32
    %2 = arith.cmpi ne, %1, %c0_i32_0 : i32
    scf.if %2 {
      %cst_8 = arith.constant 0.000000e+00 : f32
      %12 = vector.broadcast %cst_8 : f32 to vector<8x128xf32>
      %c0_9 = arith.constant 0 : index
      %c0_10 = arith.constant 0 : index
      %13 = vector.load %arg4[%c0_9, %c0_10] : memref<8x128xf32, #tpu.memory_space<vmem>>, vector<8x128xf32>
      tpu.vector_store %arg4[%c0_9, %c0_10], %12 {strides = array<i32>} : memref<8x128xf32, #tpu.memory_space<vmem>>, vector<8x128xf32>,
    } else {
    }
    %c0 = arith.constant 0 : index
    %c0_1 = arith.constant 0 : index
    %3 = vector.load %arg2[%c0, %c0_1] : memref<8x256xf32, #tpu.memory_space<vmem>>, vector<8x256xf32>
    %c0_2 = arith.constant 0 : index
    %c0_3 = arith.constant 0 : index
    %4 = vector.load %arg4[%c0_2, %c0_3] : memref<8x128xf32, #tpu.memory_space<vmem>>, vector<8x128xf32>
    %5 = vector.shape_cast %3 : vector<8x256xf32> to vector<8x2x128xf32>
    %cst = arith.constant dense<0.000000e+00> : vector<8x128xf32>
    %6 = vector.multi_reduction <add>, %5, %cst [1] : vector<8x2x128xf32> to vector<8x128xf32>
    %7 = arith.addf %4, %6 : vector<8x128xf32>
    %c0_4 = arith.constant 0 : index
    %c0_5 = arith.constant 0 : index
    %8 = vector.load %arg4[%c0_4, %c0_5] : memref<8x128xf32, #tpu.memory_space<vmem>>, vector<8x128xf32>
    tpu.vector_store %arg4[%c0_4, %c0_5], %7 {strides = array<i32>} : memref<8x128xf32, #tpu.memory_space<vmem>>, vector<8x128xf32>,
    %c0_i32_6 = arith.constant 0 : i32
    %9 = arith.cmpi eq, %arg1, %c0_i32_6 : i32
    %10 = arith.extui %9 : i1 to i32
    %c0_i32_7 = arith.constant 0 : i32
    %11 = arith.cmpi ne, %10, %c0_i32_7 : i32
    scf.if %11 {
      %c0_8 = arith.constant 0 : index
      %c0_9 = arith.constant 0 : index
      %12 = vector.load %arg4[%c0_8, %c0_9] : memref<8x128xf32, #tpu.memory_space<vmem>>, vector<8x128xf32>
      %cst_10 = arith.constant dense<0.000000e+00> : vector<8xf32>
      %13 = vector.multi_reduction <add>, %12, %cst_10 [1] : vector<8x128xf32> to vector<8xf32>
      %14 = vector.shape_cast %13 : vector<8xf32> to vector<8x1xf32>
      %cst_11 = arith.constant 3.906250e-03 : f32
      %15 = vector.broadcast %cst_11 : f32 to vector<8x1xf32>
      %16 = arith.mulf %14, %15 : vector<8x1xf32>
      %c0_12 = arith.constant 0 : index
      %c0_13 = arith.constant 0 : index
      %17 = vector.load %arg3[%c0_12, %c0_13] : memref<8x1xf32, #tpu.memory_space<vmem>>, vector<8x1xf32>
      tpu.vector_store %arg3[%c0_12, %c0_13], %16 {strides = array<i32>} : memref<8x1xf32, #tpu.memory_space<vmem>>, vector<8x1xf32>,
    } else {
    }
    return
  }
  func.func @transform_0(%arg0: i32, %arg1: i32) -> (i32, i32) {
    %c0_i32 = arith.constant 0 : i32
    return %arg0, %arg1 : i32, i32
  }
  func.func @transform_1(%arg0: i32, %arg1: i32) -> (i32, i32) {
    %c0_i32 = arith.constant 0 : i32
    %c0_i32_0 = arith.constant 0 : i32
    return %arg0, %c0_i32 : i32, i32
  }
}

</mosaic_0001>

<bundles_post_ra>
// kernel: squeeze.1
= control target key start
LH: loop header
LB: loop body
LE: loop exit
PB: predicated region body
PF: predicated region fallthrough
CT: control target
= control target key end

     0   :  { %vm8_vm0 = vcmask 31744   ;;  %s42_s0 = inlined_call_operand.vmem [shape: f32[8], index: 0, kind: input, shape index: {}]   ;;  %s43_s1 = inlined_call_operand.vmem [shape: f32[2,4], index: 1, kind: output, shape index: {}]  }
   0x1   :  { %v5_v0 = vld [vmem:[%s42_s0] sm:$0x1]  ;;  %s25_s0 = smov 124  }
   0x2   :  { %6 = vst [vmem:[#allocation1] sm:$0x1] %v5_v0 }
   0x9   :  { %v10_v1 = vld [vmem:[#allocation1] sm:$0x1]  }
   0xa   :  { %v7_v2 = vld [vmem:[#allocation1] sm:$0x1]   ;;  %11 = vrot.lane.b32.xlu0 %v10_v1, %s25_s0 }
   0xb   :  { %9 = vst.msk [vmem:[#allocation0] sm:$0x1] %vm8_vm0, %v7_v2  }
  0x7c   :  { %v12_v3 = vpop.permute.xlu0 %11  }
  0x7d   :  { %15 = vst.msk [vmem:[#allocation0 + $0x1] sm:$0x1] %vm8_vm0, %v12_v3  }
  0x84   :  { %v20_v4 = vld [vmem:[#allocation0] sm:$0x3] }
  0x85   :  { %23 = vst [vmem:[%s43_s1] sm:$0x3] %v20_v4 }

// kernel: se_forward.3
= control target key start
LH: loop header
LB: loop body
LE: loop exit
PB: predicated region body
PF: predicated region fallthrough
CT: control target
= control target key end

     0   :  { %v332_v0 = vmov 0.0   ;;  %vm333_vm0 = vmmov 0   ;;  %s506_s1 = inlined_call_operand.vmem [shape: f32[128,128], index: 1, kind: input, shape index: {}]   ;;  %s507_s3 = inlined_call_operand.vmem [shape: f32[128,128], index: 3, kind: input, shape index: {}]   ;;  %s508_s0 = inlined_call_operand.vmem [shape: f32[8,128], index: 0, kind: input, shape index: {}]   ;;  %s509_s2 = inlined_call_operand.vmem [shape: f32[1,128], index: 2, kind: input, shape index: {}]   ;;  %s510_s4 = inlined_call_operand.vmem [shape: f32[1,128], index: 4, kind: input, shape index: {}]   ;;  %s511_s5 = inlined_call_operand.vmem [shape: f32[8,128], index: 5, kind: output, shape index: {}]  }
   0x1   :  { %256 = vmatprep.subr.mxu0 %v332_v0  ;;  %v36_v1 = vld [vmem:[%s506_s1 + $0x78] sm:$0xff]  ;;  %v35_v2 = vld [vmem:[%s506_s1 + $0x70] sm:$0xff]  ;;  %288 = vmatprep.mubr.msk.f32.mxu0 %vm333_vm0, %v332_v0  ;;  %v34_v3 = vld [vmem:[%s506_s1 + $0x68] sm:$0xff] }
   0x2   :  { %257 = vmatpush3.msra.mxu0 %v36_v1  ;;  %291 = vmatprep.subr.mxu1 %v332_v0  ;;  %v33_v4 = vld [vmem:[%s506_s1 + $0x60] sm:$0xff]  ;;  %v130_v5 = vld [vmem:[%s507_s3 + $0x78] sm:$0xff]  ;;  %v129_v7 = vld [vmem:[%s507_s3 + $0x70] sm:$0xff] }
   0x3   :  { %258 = vmatprep.subr.mxu0 %v332_v0  ;;  %323 = vmatprep.mubr.msk.f32.mxu1 %vm333_vm0, %v332_v0  ;;  %v32_v6 = vld [vmem:[%s506_s1 + $0x58] sm:$0xff]  ;;  %v128_v8 = vld [vmem:[%s507_s3 + $0x68] sm:$0xff]  ;;  %v31_v9 = vld [vmem:[%s506_s1 + $0x50] sm:$0xff] }
   0x4   :  { %259 = vmatpush3.msra.mxu0 %v35_v2  ;;  %292 = vmatpush3.msra.mxu1 %v130_v5  ;;  %v127_v10 = vld [vmem:[%s507_s3 + $0x60] sm:$0xff]  ;;  %v30_v11 = vld [vmem:[%s506_s1 + $0x48] sm:$0xff]  ;;  %v126_v12 = vld [vmem:[%s507_s3 + $0x58] sm:$0xff] }
   0x5   :  { %260 = vmatprep.subr.mxu0 %v332_v0  ;;  %293 = vmatprep.subr.mxu1 %v332_v0  ;;  %v29_v13 = vld [vmem:[%s506_s1 + $0x40] sm:$0xff]  ;;  %v125_v14 = vld [vmem:[%s507_s3 + $0x50] sm:$0xff]  ;;  %v28_v15 = vld [vmem:[%s506_s1 + $0x38] sm:$0xff] }
   0x6   :  { %261 = vmatpush3.msra.mxu0 %v34_v3  ;;  %294 = vmatpush3.msra.mxu1 %v129_v7  ;;  %v124_v16 = vld [vmem:[%s507_s3 + $0x48] sm:$0xff]  ;;  %v27_v17 = vld [vmem:[%s506_s1 + $0x30] sm:$0xff]  ;;  %v123_v18 = vld [vmem:[%s507_s3 + $0x40] sm:$0xff] }
   0x7   :  { %262 = vmatprep.subr.mxu0 %v332_v0  ;;  %295 = vmatprep.subr.mxu1 %v332_v0  ;;  %v26_v19 = vld [vmem:[%s506_s1 + $0x28] sm:$0xff]  ;;  %v122_v20 = vld [vmem:[%s507_s3 + $0x38] sm:$0xff]  ;;  %v25_v21 = vld [vmem:[%s506_s1 + $0x20] sm:$0xff] }
   0x8   :  { %263 = vmatpush3.msra.mxu0 %v33_v4  ;;  %296 = vmatpush3.msra.mxu1 %v128_v8  ;;  %v121_v22 = vld [vmem:[%s507_s3 + $0x30] sm:$0xff]  ;;  %v24_v23 = vld [vmem:[%s506_s1 + $0x18] sm:$0xff]  ;;  %v120_v24 = vld [vmem:[%s507_s3 + $0x28] sm:$0xff] }
   0x9   :  { %264 = vmatprep.subr.mxu0 %v332_v0  ;;  %297 = vmatprep.subr.mxu1 %v332_v0  ;;  %v23_v25 = vld [vmem:[%s506_s1 + $0x10] sm:$0xff]  ;;  %v119_v26 = vld [vmem:[%s507_s3 + $0x20] sm:$0xff]  ;;  %v22_v27 = vld [vmem:[%s506_s1 + $0x8] sm:$0xff] }
   0xa   :  { %265 = vmatpush3.msra.mxu0 %v32_v6  ;;  %298 = vmatpush3.msra.mxu1 %v127_v10  ;;  %v118_v28 = vld [vmem:[%s507_s3 + $0x18] sm:$0xff]  ;;  %v21_v29 = vld [vmem:[%s506_s1] sm:$0xff]  ;;  %v117_v31 = vld [vmem:[%s507_s3 + $0x10] sm:$0xff] }
   0xb   :  { %266 = vmatprep.subr.mxu0 %v332_v0  ;;  %299 = vmatprep.subr.mxu1 %v332_v0  ;;  %v20_v30 = vld [vmem:[%s508_s0] sm:$0xff]  ;;  %v116_v32 = vld [vmem:[%s507_s3 + $0x8] sm:$0xff] }
   0xc   :  { %267 = vmatpush3.msra.mxu0 %v31_v9  ;;  %300 = vmatpush3.msra.mxu1 %v126_v12  ;;  %v115_v33 = vld [vmem:[%s507_s3] sm:$0xff] }
   0xd   :  { %268 = vmatprep.subr.mxu0 %v332_v0  ;;  %301 = vmatprep.subr.mxu1 %v332_v0  ;;  %v219_v34 = vld [vmem:[%s509_s2] ss:$0 sm:$0xff] }
   0xe   :  { %269 = vmatpush3.msra.mxu0 %v30_v11  ;;  %302 = vmatpush3.msra.mxu1 %v125_v14  ;;  %v220_v39 = vld [vmem:[%s510_s4] ss:$0 sm:$0xff] }
   0xf   :  { %270 = vmatprep.subr.mxu0 %v332_v0  ;;  %303 = vmatprep.subr.mxu1 %v332_v0 }
  0x10   :  { %271 = vmatpush3.msra.mxu0 %v29_v13  ;;  %304 = vmatpush3.msra.mxu1 %v124_v16 }
  0x11   :  { %272 = vmatprep.subr.mxu0 %v332_v0  ;;  %305 = vmatprep.subr.mxu1 %v332_v0 }
  0x12   :  { %273 = vmatpush3.msra.mxu0 %v28_v15  ;;  %306 = vmatpush3.msra.mxu1 %v123_v18 }
  0x13   :  { %274 = vmatprep.subr.mxu0 %v332_v0  ;;  %307 = vmatprep.subr.mxu1 %v332_v0 }
  0x14   :  { %275 = vmatpush3.msra.mxu0 %v27_v17  ;;  %308 = vmatpush3.msra.mxu1 %v122_v20 }
  0x15   :  { %276 = vmatprep.subr.mxu0 %v332_v0  ;;  %309 = vmatprep.subr.mxu1 %v332_v0 }
  0x16   :  { %277 = vmatpush3.msra.mxu0 %v26_v19  ;;  %310 = vmatpush3.msra.mxu1 %v121_v22 }
  0x17   :  { %278 = vmatprep.subr.mxu0 %v332_v0  ;;  %311 = vmatprep.subr.mxu1 %v332_v0 }
  0x18   :  { %279 = vmatpush3.msra.mxu0 %v25_v21  ;;  %312 = vmatpush3.msra.mxu1 %v120_v24 }
  0x19   :  { %280 = vmatprep.subr.mxu0 %v332_v0  ;;  %313 = vmatprep.subr.mxu1 %v332_v0 }
  0x1a   :  { %281 = vmatpush3.msra.mxu0 %v24_v23  ;;  %314 = vmatpush3.msra.mxu1 %v119_v26 }
  0x1b   :  { %282 = vmatprep.subr.mxu0 %v332_v0  ;;  %315 = vmatprep.subr.mxu1 %v332_v0 }
  0x1c   :  { %283 = vmatpush3.msra.mxu0 %v23_v25  ;;  %316 = vmatpush3.msra.mxu1 %v118_v28 }
  0x1d   :  { %284 = vmatprep.subr.mxu0 %v332_v0  ;;  %317 = vmatprep.subr.mxu1 %v332_v0 }
  0x1e   :  { %285 = vmatpush3.msra.mxu0 %v22_v27  ;;  %318 = vmatpush3.msra.mxu1 %v117_v31 }
  0x1f   :  { %286 = vmatprep.subr.mxu0 %v332_v0  ;;  %319 = vmatprep.subr.mxu1 %v332_v0 }
  0x20   :  { %287 = vmatpush3.msra.mxu0 %v21_v29  ;;  %320 = vmatpush3.msra.mxu1 %v116_v32 }
  0x21   :  { %289 = vmatmul.mubr.f32.vlgmr.msra.gmra.mxu0 %v20_v30  ;;  %321 = vmatprep.subr.mxu1 %v332_v0 }
  0x22   :  { %322 = vmatpush3.msra.mxu1 %v115_v33 }
  0xe1   :  { %v110_v35 = vpop.f32.mrf.mxu0 }
  0xe2   :  { %v111_v36 = vadd.f32 %v219_v34, %v110_v35 }
  0xe3   :  { %v290_v37 = vpop.f32.mrf.mxu0 }
  0xe4   :  { %v114_v38 = vmax.f32 %v111_v36, 0.0 }
  0xe6   :  { %324 = vmatmul.mubr.f32.vlgmr.msra.gmra.mxu1 %v114_v38 }
 0x1a6   :  { %v204_v40 = vpop.f32.mrf.mxu1 }
 0x1a7   :  { %v205_v41 = vadd.f32 %v220_v39, %v204_v40 }
 0x1a8   :  { %v325_v42 = vpop.f32.mrf.mxu1 }
 0x1a9   :  { %v221_v43 = vmul.f32 -1.442695, %v205_v41 }
 0x1ab   :  { %328 = vpow2.f32 %v221_v43 }
 0x1b8   :  { %v329_v44 = vpop.eup %328 }
 0x1b9   :  { %v211_v45 = vadd.f32 1.0, %v329_v44 }
 0x1bb   :  { %330 = vrcp.f32 %v211_v45 }
 0x1c8   :  { %v331_v46 = vpop.eup %330 }
 0x1c9   :  { %214 = vst [vmem:[%s511_s5] sm:$0xff] %v331_v46 }

// kernel: se_forward.2
= control target key start
LH: loop header
LB: loop body
LE: loop exit
PB: predicated region body
PF: predicated region fallthrough
CT: control target
= control target key end

     0   :  { %v20_v0 = vlaneseq  ;;  %v180_v1 = vmov 1983009808   ;;  %v181_v3 = vmov 1934713408   ;;  %v182_v8 = vmov 0.0   ;;  %s211_s0 = inlined_call_operand.vmem [shape: f32[8,256], index: 0, kind: input, shape index: {}]   ;;  %s212_s1 = inlined_call_operand.vmem [shape: f32[8,1], index: 1, kind: output, shape index: {}]  }
   0x1   :  { %v18_v2 = vunpack.c.l.s4 %v180_v1  ;;  %v49_v4 = vunpack.c.l.s4 %v181_v3  ;;  %v13_v5 = vld [vmem:[%s211_s0] sm:$0xff]  ;;  %v14_v6 = vld [vmem:[%s211_s0 + $0x8] sm:$0xff]  ;;  %vm82_vm0 = vcmask 1041408   ;;  %vm147_vm1 = vcmask 1041409  }
   0x2   :  { %v21_v7 = vshrl.u32 %v20_v0, 7  ;;  %v16_v9 = vcombine.high %v13_v5, %v182_v8  ;;  %v31_v11 = vcombine.high %v14_v6, %v182_v8  ;;  %vm149_vm2 = vcmask 1042434  }
   0x3   :  { %v19_v10 = vunpack.c.0.s8 %v18_v2  ;;  %v50_v12 = vunpack.c.0.s8 %v49_v4  ;;  %vm151_vm3 = vcmask 1043459   ;;  %vm153_vm4 = vcmask 1044484  }
   0x4   :  { %vm155_vm5 = vcmask 1045509   ;;  %vm157_vm6 = vcmask 1046534   ;;  %vm159_vm7 = vcmask 1047559   ;;  %vm171_vm8 = vcmask 7168  }
   0x5   :  { %v22_v13 = vsub.s32 %v19_v10, %v21_v7  ;;  %v53_v14 = vsub.s32 %v50_v12, %v21_v7 }
   0x7   :  { %v23_v15 = vrot.slane %v13_v5, %v22_v13  ;;  %v30_v16 = vrot.slane %v16_v9, %v22_v13  ;;  %v38_v17 = vrot.slane %v14_v6, %v22_v13  ;;  %v45_v18 = vrot.slane %v31_v11, %v22_v13 }
   0x9   :  { %v46_v19 = vcombine.low %v23_v15, %v38_v17  ;;  %v47_v20 = vcombine.high %v23_v15, %v38_v17  ;;  %v62_v21 = vcombine.low %v30_v16, %v45_v18  ;;  %v63_v22 = vcombine.high %v30_v16, %v45_v18 }
   0xb   :  { %v54_v23 = vrot.slane %v46_v19, %v53_v14  ;;  %v61_v24 = vrot.slane %v47_v20, %v53_v14  ;;  %v70_v25 = vrot.slane %v62_v21, %v53_v14  ;;  %v77_v26 = vrot.slane %v63_v22, %v53_v14 }
   0xd   :  { %v78_v27 = vcombine.high %v54_v23, %v182_v8  ;;  %v79_v28 = vcombine.high %v61_v24, %v182_v8  ;;  %v80_v29 = vcombine.high %v70_v25, %v182_v8  ;;  %v81_v30 = vcombine.high %v77_v26, %v182_v8 }
   0xe   :  { %v83_v31 = vsel %vm82_vm0, %v54_v23, 0.0  ;;  %v97_v32 = vsel %vm82_vm0, %v61_v24, 0.0  ;;  %v111_v33 = vsel %vm82_vm0, %v70_v25, 0.0  ;;  %v125_v34 = vsel %vm82_vm0, %v77_v26, 0.0 }
   0xf   :  { %v84_v35 = vrot.slane %v83_v31, 4  ;;  %v90_v36 = vsel %vm82_vm0, %v78_v27, 0.0  ;;  %v98_v37 = vrot.slane %v97_v32, 4  ;;  %v104_v38 = vsel %vm82_vm0, %v79_v28, 0.0 }
  0x10   :  { %v91_v39 = vrot.slane %v90_v36, 4  ;;  %v105_v40 = vrot.slane %v104_v38, 4  ;;  %v112_v41 = vrot.slane %v111_v33, 4  ;;  %v118_v42 = vsel %vm82_vm0, %v80_v29, 0.0 }
  0x11   :  { %v85_v43 = vadd.f32 %v84_v35, %v83_v31  ;;  %v99_v44 = vadd.f32 %v98_v37, %v97_v32  ;;  %v119_v45 = vrot.slane %v118_v42, 4  ;;  %v126_v46 = vrot.slane %v125_v34, 4 }
  0x12   :  { %v92_v47 = vadd.f32 %v91_v39, %v90_v36  ;;  %v106_v48 = vadd.f32 %v105_v40, %v104_v38  ;;  %v113_v49 = vadd.f32 %v112_v41, %v111_v33  ;;  %v132_v50 = vsel %vm82_vm0, %v81_v30, 0.0 }
  0x13   :  { %v86_v51 = vrot.slane %v85_v43, 2  ;;  %v100_v52 = vrot.slane %v99_v44, 2  ;;  %v120_v53 = vadd.f32 %v119_v45, %v118_v42  ;;  %v127_v54 = vadd.f32 %v126_v46, %v125_v34 }
  0x14   :  { %v93_v55 = vrot.slane %v92_v47, 2  ;;  %v107_v56 = vrot.slane %v106_v48, 2  ;;  %v114_v57 = vrot.slane %v113_v49, 2  ;;  %v133_v58 = vrot.slane %v132_v50, 4 }
  0x15   :  { %v87_v59 = vadd.f32 %v86_v51, %v85_v43  ;;  %v101_v60 = vadd.f32 %v100_v52, %v99_v44  ;;  %v121_v61 = vrot.slane %v120_v53, 2  ;;  %v128_v62 = vrot.slane %v127_v54, 2 }
  0x16   :  { %v94_v63 = vadd.f32 %v93_v55, %v92_v47  ;;  %v108_v0 = vadd.f32 %v107_v56, %v106_v48  ;;  %v115_v1 = vadd.f32 %v114_v57, %v113_v49  ;;  %v134_v2 = vadd.f32 %v133_v58, %v132_v50 }
  0x17   :  { %v88_v3 = vrot.slane %v87_v59, 1  ;;  %v102_v4 = vrot.slane %v101_v60, 1  ;;  %v122_v5 = vadd.f32 %v121_v61, %v120_v53  ;;  %v129_v6 = vadd.f32 %v128_v62, %v127_v54 }
  0x18   :  { %v95_v7 = vrot.slane %v94_v63, 1  ;;  %v109_v8 = vrot.slane %v108_v0, 1  ;;  %v116_v9 = vrot.slane %v115_v1, 1  ;;  %v135_v10 = vrot.slane %v134_v2, 2 }
  0x19   :  { %v89_v11 = vadd.f32 %v88_v3, %v87_v59  ;;  %v103_v12 = vadd.f32 %v102_v4, %v101_v60  ;;  %v123_v13 = vrot.slane %v122_v5, 1  ;;  %v130_v14 = vrot.slane %v129_v6, 1 }
  0x1a   :  { %v96_v15 = vadd.f32 %v95_v7, %v94_v63  ;;  %v110_v16 = vadd.f32 %v109_v8, %v108_v0  ;;  %v136_v17 = vadd.f32 %v135_v10, %v134_v2  ;;  %v117_v18 = vadd.f32 %v116_v9, %v115_v1 }
  0x1b   :  { %v124_v19 = vadd.f32 %v123_v13, %v122_v5  ;;  %v131_v22 = vadd.f32 %v130_v14, %v129_v6 }
  0x1c   :  { %v137_v20 = vrot.slane %v136_v17, 1  ;;  %v148_v21 = vsel %vm147_vm1, %v96_v15, %v89_v11 }
  0x1d   :  { %v150_v23 = vsel %vm149_vm2, %v103_v12, %v148_v21 }
  0x1e   :  { %v138_v24 = vadd.f32 %v137_v20, %v136_v17  ;;  %v152_v25 = vsel %vm151_vm3, %v110_v16, %v150_v23 }
  0x1f   :  { %v154_v26 = vsel %vm153_vm4, %v117_v18, %v152_v25 }
  0x20   :  { %v156_v27 = vsel %vm155_vm5, %v124_v19, %v154_v26 }
  0x21   :  { %v158_v28 = vsel %vm157_vm6, %v131_v22, %v156_v27 }
  0x22   :  { %v160_v29 = vsel %vm159_vm7, %v138_v24, %v158_v28 }
  0x23   :  { %168 = vadd.xlane.f32.xlu0 %v160_v29 }
  0xac   :  { %v169_v30 = vpop.xlane.xlu0 %168 }
  0xad   :  { %v170_v31 = vmul.f32 0.00390625, %v169_v30 }
  0xaf   :  { %172 = vst.msk [vmem:[%s212_s1] sm:$0xff] %vm171_vm8, %v170_v31 }

</bundles_post_ra>
